<compile_context>
chip_gen: v7x
topology: tpu7x:2x2x1
jax: 0.10.0
libtpu: 0.0.40
codegen_flags: <defaults>
</compile_context>

<pallas_src>
import functools

import jax
import jax.numpy as jnp
from jax.experimental import pallas as pl
from jax.experimental.pallas import tpu as pltpu


def _round_up(x, m):
    return ((x + m - 1) // m) * m


# ----------------------------------------------------------------------------
# Kernel
# ----------------------------------------------------------------------------
def _mlp_kernel(x_ref, w1_ref, b1_ref, wf_ref, bf_ref, o_ref, *,
                num_layers, compute_dtype):
    """One batch tile of the full forward pass, resident in VMEM.

    x_ref : (TB, D)  float32 (cast to compute dtype in-kernel)
    w1_ref: (D, H)   compute dtype, (in, out) layout, resident
    b1_ref: (1, H)   float32, resident
    wf_ref: (H, OP)  compute dtype, (in, out) layout, zero-padded lanes, resident
    bf_ref: (1, OP)  float32, zero-padded, resident
    o_ref : (TB, OP) float32 output slab (lane-dense, unmasked store)
    """
    # In-kernel cast: avoids a separate XLA pass over x in HBM; the VPU cast is
    # fully hidden under the MXU-bound recurrence.
    h = x_ref[...].astype(compute_dtype)
    w1 = w1_ref[...]
    b1 = b1_ref[...]          # (1, H) f32 — implicit broadcast in the add below

    for _ in range(num_layers):                                    # static unroll
        acc = jnp.dot(h, w1, preferred_element_type=jnp.float32)   # MXU, f32 acc
        h = jnp.maximum(acc + b1, 0.0).astype(compute_dtype)       # VPU

    out = jnp.dot(h, wf_ref[...], preferred_element_type=jnp.float32) + bf_ref[...]
    o_ref[...] = out.astype(o_ref.dtype)


# ----------------------------------------------------------------------------
# Parameter prep (call once, outside the hot path)
# ----------------------------------------------------------------------------
def prepare_params(w1, b1, wf, bf, *, compute_dtype=jnp.bfloat16):
    """w1: (hidden, in) PyTorch layout -> (in, hidden) compute dtype.
       wf: (out, hidden)              -> (hidden, out_padded) compute dtype.
       b1: (hidden,)                  -> (1, hidden) f32.
       bf: (out,)                     -> (1, out_padded) f32 (zero pad)."""
    H, D = w1.shape
    O = wf.shape[0]
    OP = _round_up(O, 128)                 # lane-dense output width

    w1_t = jnp.transpose(w1).astype(compute_dtype)                       # (D, H)
    wf_t = jnp.zeros((H, OP), compute_dtype).at[:, :O].set(
        jnp.transpose(wf).astype(compute_dtype))                         # (H, OP)
    b1_2d = b1.reshape(1, H).astype(jnp.float32)
    bf_2d = jnp.zeros((1, OP), jnp.float32).at[:, :O].set(bf.astype(jnp.float32))
    return (w1_t, b1_2d, wf_t, bf_2d, O)


# ----------------------------------------------------------------------------
# Tiling / VMEM sizing helpers
# ----------------------------------------------------------------------------
def _device_tiling_profile():
    """Returns (max_batch_tile, two_tensorcores) for the local TPU generation."""
    try:
        kind = jax.devices()[0].device_kind.lower()
    except Exception:
        return 256, True
    if "v5" in kind or "v6" in kind:
        # Single TensorCore per chip, 128 MiB VMEM: large tiles amortize the
        # ~0.35us/grid-step overhead and keep M >= 512 for the MXU.
        return 512, False
    # v7x-like: 2 TensorCores per chip, 64 MiB VMEM: smaller tiles, grid >= 2.
    return 256, True


def _choose_batch_tiling(B, max_tb, two_cores):
    """Pick (batch_tile, padded_batch). Prefers a tile dividing B (no pad pass)."""
    granule = 8  # f32 sublane granule (x stays f32; the bf16 cast is in-kernel)
    if B <= granule:
        return granule, granule
    cands = [t for t in (512, 256, 128, 64, 32, 16, 8) if t <= max_tb]
    if two_cores:
        # Keep at least 2 grid steps so both TensorCores get work.
        multi = [t for t in cands if pl.cdiv(B, t) >= 2]
        if multi:
            cands = multi
    for t in cands:                 # prefer no wrapper-side jnp.pad copy of x
        if B % t == 0:
            return t, B
    t = cands[0]                    # ragged batch: pad only the tail tile
    return t, _round_up(B, t)


def _vmem_limit_bytes(TB, D, H, OP, compute_dtype):
    """Shape-derived VMEM budget (+30% headroom), capped by physical VMEM."""
    cbytes = jnp.dtype(compute_dtype).itemsize
    weights = D * H * cbytes + H * OP * cbytes + (H + OP) * 4   # single-buffered
    x_tile = 2 * TB * D * 4          # double-buffered f32 input tile
    o_tile = 2 * TB * OP * 4         # double-buffered f32 output tile
    interm = TB * H * (4 + cbytes) + TB * D * cbytes  # f32 acc + bf16 h + cast x
    need = int((weights + x_tile + o_tile + interm) * 1.3)
    try:
        phys = int(pltpu.get_tpu_info().vmem_capacity_bytes)
    except Exception:
        phys = 64 << 20              # conservative (v7x per-TensorCore VMEM)
    cap = min((phys * 7) // 8, 100 << 20)
    return max(min(need, cap), 16 << 20)


def _resident_spec(shape):
    """Constant-index (fetch-once) BlockSpec, single-buffered to halve its VMEM."""
    index_map = lambda i: (0,) * len(shape)
    try:
        return pl.BlockSpec(shape, index_map, pipeline_mode=pl.Buffered(1))
    except TypeError:  # older Pallas without the pipeline_mode kwarg
        return pl.BlockSpec(shape, index_map)


# ----------------------------------------------------------------------------
# Forward wrapper
# ----------------------------------------------------------------------------
def mlp_forward_prepared(x_nchw, params, *, num_layers,
                         compute_dtype=jnp.bfloat16):
    """Forward pass with pre-prepared params. x_nchw: (B, C, H, W)."""
    w1_t, b1_2d, wf_t, bf_2d, O = params
    B = x_nchw.shape[0]
    x = x_nchw.reshape(B, -1).astype(jnp.float32)   # == torch x.view(B, -1); no cast pass
    D = x.shape[1]
    H = w1_t.shape[1]
    OP = wf_t.shape[1]

    if w1_t.shape[0] != D:
        raise ValueError(f"recurrent_layer1 expects input_dim={w1_t.shape[0]}, "
                         f"but flattened x has {D} features.")
    if num_layers > 1 and D != H:
        raise ValueError(
            "recurrent_layer1 is applied repeatedly, so input_dim must equal "
            f"hidden_dim when num_layers > 1 (got input_dim={D}, hidden_dim={H}); "
            "this mirrors the PyTorch module's constraint.")

    max_tb, two_cores = _device_tiling_profile()
    TB, B_pad = _choose_batch_tiling(B, max_tb, two_cores)
    if B_pad != B:
        # Only for ragged batches (the common multiple-of-tile case skips this).
        x = jnp.pad(x, ((0, B_pad - B), (0, 0)))
    grid = (B_pad // TB,)

    flops = 2 * B_pad * D * H * num_layers + 2 * B_pad * H * OP
    bytes_accessed = (x.size * 4
                      + w1_t.size * w1_t.dtype.itemsize
                      + wf_t.size * wf_t.dtype.itemsize
                      + (b1_2d.size + bf_2d.size) * 4
                      + B_pad * OP * 4)

    out_padded = pl.pallas_call(
        functools.partial(_mlp_kernel, num_layers=num_layers,
                          compute_dtype=compute_dtype),
        out_shape=jax.ShapeDtypeStruct((B_pad, OP), jnp.float32),
        grid=grid,
        in_specs=[
            pl.BlockSpec((TB, D), lambda i: (i, 0)),   # activations: batch-tiled
            _resident_spec((D, H)),                    # W1 (fetch once, 1 buffer)
            _resident_spec((1, H)),                    # b1
            _resident_spec((H, OP)),                   # Wf (zero-padded lanes)
            _resident_spec((1, OP)),                   # bf
        ],
        out_specs=pl.BlockSpec((TB, OP), lambda i: (i, 0)),
        compiler_params=pltpu.CompilerParams(
            # Batch axis is embarrassingly parallel -> sharded across the two
            # TensorCores on v7x-class parts.
            dimension_semantics=("parallel",),
            vmem_limit_bytes=_vmem_limit_bytes(TB, D, H, OP, compute_dtype),
        ),
        cost_estimate=pl.CostEstimate(flops=flops, transcendentals=0,
                                      bytes_accessed=bytes_accessed),
    )(x, w1_t, b1_2d, wf_t, bf_2d)

    return out_padded[:B, :O]


def mlp_forward(x_nchw, w1, b1, wf, bf, *, num_layers,
                compute_dtype=jnp.bfloat16):
    """Convenience wrapper: prep + forward (prefer caching prepare_params)."""
    params = prepare_params(w1, b1, wf, bf, compute_dtype=compute_dtype)
    return mlp_forward_prepared(x_nchw, params, num_layers=num_layers,
                                compute_dtype=compute_dtype)


# ----------------------------------------------------------------------------
# References
# ----------------------------------------------------------------------------
def _reference_f32(x_nchw, w1, b1, wf, bf, num_layers):
    x = x_nchw.reshape(x_nchw.shape[0], -1)
    for _ in range(num_layers):
        x = jnp.maximum(x @ w1.T + b1, 0.0)
    return x @ wf.T + bf


def _reference_policy(x_nchw, w1, b1, wf, bf, num_layers):
    """Same bf16-operand / f32-accumulate policy as the kernel, in plain JAX."""
    h = x_nchw.reshape(x_nchw.shape[0], -1).astype(jnp.bfloat16)
    w1_t = w1.T.astype(jnp.bfloat16)
    wf_t = wf.T.astype(jnp.bfloat16)
    b1f = b1.astype(jnp.float32)
    for _ in range(num_layers):
        acc = jnp.dot(h, w1_t, preferred_element_type=jnp.float32)
        h = jnp.maximum(acc + b1f, 0.0).astype(jnp.bfloat16)
    return jnp.dot(h, wf_t, preferred_element_type=jnp.float32) + bf.astype(jnp.float32)


if __name__ == "__main__":
    # Small shapes consistent with the module: flattened input dim must equal
    # hidden dim for the recurrence (as in the PyTorch code).
    B, C, Hs, Ws = 2, 2, 4, 4          # -> input_dim = 32
    input_dim = C * Hs * Ws            # 32
    hidden_dim = 32                    # == input_dim (required by the recurrence)
    output_dim = 10
    num_layers = 3

    key = jax.random.PRNGKey(0)
    kx, k1, k2, k3, k4 = jax.random.split(key, 5)

    x = jax.random.normal(kx, (B, C, Hs, Ws), dtype=jnp.float32)

    # Deterministic PyTorch-style init: U(-1/sqrt(fan_in), 1/sqrt(fan_in)).
    bound1 = 1.0 / (input_dim ** 0.5)
    w1 = jax.random.uniform(k1, (hidden_dim, input_dim), jnp.float32, -bound1, bound1)
    b1 = jax.random.uniform(k2, (hidden_dim,), jnp.float32, -bound1, bound1)
    bound2 = 1.0 / (hidden_dim ** 0.5)
    wf = jax.random.uniform(k3, (output_dim, hidden_dim), jnp.float32, -bound2, bound2)
    bf = jax.random.uniform(k4, (output_dim,), jnp.float32, -bound2, bound2)

    # One-time weight transpose/pad/cast, hoisted out of the hot path.
    params = prepare_params(w1, b1, wf, bf)

    out = mlp_forward_prepared(x, params, num_layers=num_layers)
    out = jax.block_until_ready(out)
    assert out.shape == (B, output_dim), out.shape

    # Tight check against a pure-JAX reference using the same dtype policy.
    ref_bf16 = _reference_policy(x, w1, b1, wf, bf, num_layers)
    assert jnp.allclose(out, ref_bf16, atol=1e-3, rtol=1e-3), \
        "mismatch vs bf16-policy reference"

    # Sanity check against the full-f32 reference (bf16 matmul rounding slack).
    ref_f32 = _reference_f32(x, w1, b1, wf, bf, num_layers)
    assert jnp.allclose(out, ref_f32, atol=3e-2, rtol=3e-2), \
        "mismatch vs f32 reference"

    print("KERNEL_OK")
</pallas_src>

<mosaic_0001>
module attributes {stable_mosaic.version = 11 : i64} {
  func.func @_mlp_kernel(%arg0: i32, %arg1: memref<8x32xf32, #tpu.memory_space<vmem>>, %arg2: memref<32x32xbf16, #tpu.memory_space<vmem>>, %arg3: memref<1x32xf32, #tpu.memory_space<vmem>>, %arg4: memref<32x128xbf16, #tpu.memory_space<vmem>>, %arg5: memref<1x128xf32, #tpu.memory_space<vmem>>, %arg6: memref<8x128xf32, #tpu.memory_space<vmem>>) attributes {dimension_semantics = [#tpu.dimension_semantics<parallel>], iteration_bounds = array<i64: 1>, scalar_prefetch = 0 : i64, scratch_operands = 0 : i64, tpu.core_type = #tpu.core_type<tc>, window_params = [{transform_indices = @transform_0, window_bounds = array<i64: 8, 32>}, {pipeline_mode = #tpu.pipeline_mode<synchronous>, transform_indices = @transform_1, window_bounds = array<i64: 32, 32>}, {pipeline_mode = #tpu.pipeline_mode<synchronous>, transform_indices = @transform_2, window_bounds = array<i64: 1, 32>}, {pipeline_mode = #tpu.pipeline_mode<synchronous>, transform_indices = @transform_3, window_bounds = array<i64: 32, 128>}, {pipeline_mode = #tpu.pipeline_mode<synchronous>, transform_indices = @transform_4, window_bounds = array<i64: 1, 128>}, {transform_indices = @transform_5, window_bounds = array<i64: 8, 128>}]} {
    %c0 = arith.constant 0 : index
    %c0_0 = arith.constant 0 : index
    %0 = vector.load %arg1[%c0, %c0_0] : memref<8x32xf32, #tpu.memory_space<vmem>>, vector<8x32xf32>
    %1 = arith.truncf %0 : vector<8x32xf32> to vector<8x32xbf16>
    %c0_1 = arith.constant 0 : index
    %c0_2 = arith.constant 0 : index
    %2 = vector.load %arg2[%c0_1, %c0_2] : memref<32x32xbf16, #tpu.memory_space<vmem>>, vector<32x32xbf16>
    %c0_3 = arith.constant 0 : index
    %c0_4 = arith.constant 0 : index
    %3 = vector.load %arg3[%c0_3, %c0_4] : memref<1x32xf32, #tpu.memory_space<vmem>>, vector<1x32xf32>
    %cst = arith.constant dense<0.000000e+00> : vector<8x32xf32>
    %4 = tpu.matmul %1, %2, %cst {dimension_numbers = #tpu.dot_dimension_numbers<[1], [0], [0], [1], [0, 0, 1, 1], [], []>} : vector<8x32xbf16>, vector<32x32xbf16>, vector<8x32xf32> -> vector<8x32xf32>
    %5 = vector.broadcast %3 : vector<1x32xf32> to vector<8x32xf32>
    %6 = arith.addf %4, %5 : vector<8x32xf32>
    %cst_5 = arith.constant 0.000000e+00 : f32
    %7 = vector.broadcast %cst_5 : f32 to vector<8x32xf32>
    %8 = arith.maximumf %6, %7 : vector<8x32xf32>
    %9 = arith.truncf %8 : vector<8x32xf32> to vector<8x32xbf16>
    %cst_6 = arith.constant dense<0.000000e+00> : vector<8x32xf32>
    %10 = tpu.matmul %9, %2, %cst_6 {dimension_numbers = #tpu.dot_dimension_numbers<[1], [0], [0], [1], [0, 0, 1, 1], [], []>} : vector<8x32xbf16>, vector<32x32xbf16>, vector<8x32xf32> -> vector<8x32xf32>
    %11 = vector.broadcast %3 : vector<1x32xf32> to vector<8x32xf32>
    %12 = arith.addf %10, %11 : vector<8x32xf32>
    %cst_7 = arith.constant 0.000000e+00 : f32
    %13 = vector.broadcast %cst_7 : f32 to vector<8x32xf32>
    %14 = arith.maximumf %12, %13 : vector<8x32xf32>
    %15 = arith.truncf %14 : vector<8x32xf32> to vector<8x32xbf16>
    %cst_8 = arith.constant dense<0.000000e+00> : vector<8x32xf32>
    %16 = tpu.matmul %15, %2, %cst_8 {dimension_numbers = #tpu.dot_dimension_numbers<[1], [0], [0], [1], [0, 0, 1, 1], [], []>} : vector<8x32xbf16>, vector<32x32xbf16>, vector<8x32xf32> -> vector<8x32xf32>
    %17 = vector.broadcast %3 : vector<1x32xf32> to vector<8x32xf32>
    %18 = arith.addf %16, %17 : vector<8x32xf32>
    %cst_9 = arith.constant 0.000000e+00 : f32
    %19 = vector.broadcast %cst_9 : f32 to vector<8x32xf32>
    %20 = arith.maximumf %18, %19 : vector<8x32xf32>
    %21 = arith.truncf %20 : vector<8x32xf32> to vector<8x32xbf16>
    %c0_10 = arith.constant 0 : index
    %c0_11 = arith.constant 0 : index
    %22 = vector.load %arg4[%c0_10, %c0_11] : memref<32x128xbf16, #tpu.memory_space<vmem>>, vector<32x128xbf16>
    %cst_12 = arith.constant dense<0.000000e+00> : vector<8x128xf32>
    %23 = tpu.matmul %21, %22, %cst_12 {dimension_numbers = #tpu.dot_dimension_numbers<[1], [0], [0], [1], [0, 0, 1, 1], [], []>} : vector<8x32xbf16>, vector<32x128xbf16>, vector<8x128xf32> -> vector<8x128xf32>
    %c0_13 = arith.constant 0 : index
    %c0_14 = arith.constant 0 : index
    %24 = vector.load %arg5[%c0_13, %c0_14] : memref<1x128xf32, #tpu.memory_space<vmem>>, vector<1x128xf32>
    %25 = vector.broadcast %24 : vector<1x128xf32> to vector<8x128xf32>
    %26 = arith.addf %23, %25 : vector<8x128xf32>
    %c0_15 = arith.constant 0 : index
    %c0_16 = arith.constant 0 : index
    %27 = vector.load %arg6[%c0_15, %c0_16] : memref<8x128xf32, #tpu.memory_space<vmem>>, vector<8x128xf32>
    tpu.vector_store %arg6[%c0_15, %c0_16], %26 {strides = array<i32>} : memref<8x128xf32, #tpu.memory_space<vmem>>, vector<8x128xf32>,
    return
  }
  func.func @transform_0(%arg0: i32) -> (i32, i32) {
    %c0_i32 = arith.constant 0 : i32
    %c0_i32_0 = arith.constant 0 : i32
    return %arg0, %c0_i32 : i32, i32
  }
  func.func @transform_1(%arg0: i32) -> (i32, i32) {
    %c0_i32 = arith.constant 0 : i32
    %c0_i32_0 = arith.constant 0 : i32
    %c0_i32_1 = arith.constant 0 : i32
    return %c0_i32, %c0_i32_0 : i32, i32
  }
  func.func @transform_2(%arg0: i32) -> (i32, i32) {
    %c0_i32 = arith.constant 0 : i32
    %c0_i32_0 = arith.constant 0 : i32
    %c0_i32_1 = arith.constant 0 : i32
    return %c0_i32, %c0_i32_0 : i32, i32
  }
  func.func @transform_3(%arg0: i32) -> (i32, i32) {
    %c0_i32 = arith.constant 0 : i32
    %c0_i32_0 = arith.constant 0 : i32
    %c0_i32_1 = arith.constant 0 : i32
    return %c0_i32, %c0_i32_0 : i32, i32
  }
  func.func @transform_4(%arg0: i32) -> (i32, i32) {
    %c0_i32 = arith.constant 0 : i32
    %c0_i32_0 = arith.constant 0 : i32
    %c0_i32_1 = arith.constant 0 : i32
    return %c0_i32, %c0_i32_0 : i32, i32
  }
  func.func @transform_5(%arg0: i32) -> (i32, i32) {
    %c0_i32 = arith.constant 0 : i32
    %c0_i32_0 = arith.constant 0 : i32
    return %arg0, %c0_i32 : i32, i32
  }
}

</mosaic_0001>

<bundles_post_ra>
// kernel: tpu_custom_call.1
= control target key start
LH: loop header
LB: loop body
LE: loop exit
PB: predicated region body
PF: predicated region fallthrough
CT: control target
= control target key end

     0   :  { %10 = vsyncpa [#allocation3], 0  ;;  %s571_s0 = inlined_call_operand.hbm [shape: f32[8,32], index: 0, kind: input, shape index: {}]   ;;  %s572_s1 = inlined_call_operand.hbm [shape: bf16[32,32], index: 1, kind: input, shape index: {}]   ;;  %s573_s2 = inlined_call_operand.vmem [shape: f32[1,32], index: 2, kind: input, shape index: {}]   ;;  %s574_s3 = inlined_call_operand.hbm [shape: bf16[32,128], index: 3, kind: input, shape index: {}]   ;;  %s575_s4 = inlined_call_operand.vmem [shape: f32[1,128], index: 4, kind: input, shape index: {}]   ;;  %s576_s5 = inlined_call_operand.hbm [shape: f32[8,128], index: 5, kind: output, shape index: {}]  }
   0x1   :  { %11 = vsyncpa [#allocation6], 0 }
   0x2   :  { %12 = vsyncpa [#allocation4], 0  ;;  %s465_s18 = smov [#allocation5]   ;;  %s371_s22 = scalar_lea.hbm %s572_s1, 256 }
   0x3   :  { %s28_s19 = sshll.u32 %s465_s18, 4  ;;  %p372_p0 = scmp.ne.s32.totalorder %s572_s1, %s371_s22  ;;  %s29_s19 = int_to_ptr.vmem [resolvable:$true] %s28_s19 }
   0x4   :  { %p375_p1 = scmp.lt.u32.totalorder %s371_s22, %s572_s1 }
   0x6   :  { %p377_p2 = pnand %p375_p1, %p372_p0 }
   0x8   :  { %380 = shalt.err (!%p377_p2)
}
   0x9   :  { %s381_s27 = scalar_lea.vmem %s29_s19, 256  ;;  %p386_p4 = scmp.lt.s32.totalorder %s29_s19, %s29_s19 }
   0xa   :  { %p382_p3 = scmp.ne.s32.totalorder %s29_s19, %s381_s27  ;;  %p387_p5 = scmp.lt.s32.totalorder %s381_s27, %s381_s27 }
   0xc   :  { %p388_p6 = por %p387_p5, %p386_p4 }
   0xe   :  { %p389_p7 = pnand %p388_p6, %p382_p3 }
  0x10   :  { %392 = shalt.err (!%p389_p7)
}
  0x11   :  { %s466_s28 = smov 64   ;;  %s467_s29 = smov 4  }
  0x12   :  { %34 = dma.hbm_to_vmem [thread:$0]  %s572_s1, 256, %s29_s19, [#allocation6], %s466_s28, %s466_s28, %s467_s29  }
  0x13   :  { %s468_s7 = smov [#allocation2]   ;;  %s469_s9 = smov [#allocation7]  }
  0x14   :  { %s19_s8 = sshll.u32 %s468_s7, 4  ;;  %s42_s10 = sshll.u32 %s469_s9, 4  ;;  %s20_s8 = int_to_ptr.vmem [resolvable:$true] %s19_s8  ;;  %s43_s10 = int_to_ptr.vmem [resolvable:$true] %s42_s10 }
  0x15   :  { %s393_s13 = scalar_lea.hbm %s571_s0, 128 }
  0x16   :  { %p394_p8 = scmp.ne.s32.totalorder %s571_s0, %s393_s13  ;;  %p397_p9 = scmp.lt.u32.totalorder %s393_s13, %s571_s0 }
  0x18   :  { %p399_p10 = pnand %p397_p9, %p394_p8 }
  0x1a   :  { %402 = shalt.err (!%p399_p10)
}
  0x1b   :  { %s403_s1 = scalar_lea.vmem %s20_s8, 128  ;;  %p408_p12 = scmp.lt.s32.totalorder %s20_s8, %s20_s8 }
  0x1c   :  { %p404_p11 = scmp.ne.s32.totalorder %s20_s8, %s403_s1  ;;  %p409_p13 = scmp.lt.s32.totalorder %s403_s1, %s403_s1 }
  0x1e   :  { %p410_p0 = por %p409_p13, %p408_p12 }
  0x20   :  { %p411_p1 = pnand %p410_p0, %p404_p11 }
  0x22   :  { %414 = shalt.err (!%p411_p1)
}
  0x23   :  { %22 = dma.hbm_to_vmem [thread:$0]  %s571_s0, 128, %s20_s8, [#allocation3]  }
  0x24   :  { %s415_s22 = scalar_lea.hbm %s574_s3, 256 }
  0x25   :  { %p416_p2 = scmp.ne.s32.totalorder %s574_s3, %s415_s22  ;;  %p419_p3 = scmp.lt.u32.totalorder %s415_s22, %s574_s3 }
  0x27   :  { %p421_p4 = pnand %p419_p3, %p416_p2 }
  0x29   :  { %424 = shalt.err (!%p421_p4)
}
  0x2a   :  { %s425_s27 = scalar_lea.vmem %s43_s10, 256  ;;  %p430_p6 = scmp.lt.s32.totalorder %s43_s10, %s43_s10 }
  0x2b   :  { %p426_p5 = scmp.ne.s32.totalorder %s43_s10, %s425_s27  ;;  %p431_p7 = scmp.lt.s32.totalorder %s425_s27, %s425_s27 }
  0x2d   :  { %p432_p8 = por %p431_p7, %p430_p6 }
  0x2f   :  { %p433_p9 = pnand %p432_p8, %p426_p5 }
  0x31   :  { %436 = shalt.err (!%p433_p9)
}
  0x32   :  { %48 = dma.hbm_to_vmem [thread:$0]  %s574_s3, 256, %s43_s10, [#allocation6], %s466_s28, %s466_s28, %s467_s29  }
  0x33   :  { %459 = dma.done.wait [#allocation3], 128  }
  0x34   :  { %460 = vsyncadd [#allocation3], 4294967168 }
  0x35   :  { %461 = dma.done.wait [#allocation6], 512  }
  0x36   :  { %462 = vsyncadd [#allocation6], 4294966784  ;;  %v470_v0 = vmov 0.0   ;;  %vm471_vm0 = vmmov 0   ;;  %v367_v1 = vld [vmem:[#allocation5] sm:$0xff]   ;;  %v368_v2 = vld [vmem:[#allocation5 + $0x8] sm:$0xff]  }
  0x37   :  { %327 = vmatprep.subr.bf16.mxu0 %v470_v0  ;;  %331 = vmatprep.mubr.msk.bf16.mxu0 %vm471_vm0, %v470_v0  ;;  %v61_v3 = vld [vmem:[#allocation2] sm:$0xff]  ;;  %vm86_vm1 = vcmask 261120   ;;  %v369_v13 = vld [vmem:[#allocation7] sm:$0xff]   ;;  %s472_s6 = smov [#allocation8]  }
  0x38   :  { %335 = vmatprep.subr.bf16.mxu1 %v470_v0  ;;  %339 = vmatprep.mubr.msk.bf16.mxu1 %vm471_vm0, %v470_v0  ;;  %v62_v4 = vpack.c.bf16 %v61_v3, %v61_v3  ;;  %v305_v5 = vld [vmem:[%s573_s2] ss:$0 sm:$0xff]  ;;  %s295_s7 = sshll.u32 %s472_s6, 4  ;;  %s296_s7 = int_to_ptr.vmem [resolvable:$true] %s295_s7 }
  0x39   :  { %328 = vmatpush3.bf16.msra.mxu0 %v367_v1  ;;  %336 = vmatpush3.bf16.msra.mxu1 %v367_v1  ;;  %v370_v21 = vld [vmem:[#allocation7 + $0x8] sm:$0xff]   ;;  %s437_s8 = scalar_lea.vmem %s296_s7, 128  ;;  %p442_p11 = scmp.lt.s32.totalorder %s296_s7, %s296_s7 }
  0x3a   :  { %329 = vmatprep.subr.bf16.mxu0 %v470_v0  ;;  %337 = vmatprep.subr.bf16.mxu1 %v470_v0  ;;  %v311_v29 = vld [vmem:[%s575_s4] ss:$0 sm:$0xff]  ;;  %p438_p10 = scmp.ne.s32.totalorder %s296_s7, %s437_s8  ;;  %p443_p12 = scmp.lt.s32.totalorder %s437_s8, %s437_s8 }
  0x3c   :  { %p444_p13 = por %p443_p12, %p442_p11 }
  0x3d   :  { %330 = vmatpush3.bf16.msra.mxu0 %v368_v2  ;;  %338 = vmatpush3.bf16.msra.mxu1 %v368_v2 }
  0x3e   :  { %343 = vmatprep.subr.bf16.mxu0 %v470_v0  ;;  %351 = vmatprep.subr.bf16.mxu1 %v470_v0  ;;  %p445_p0 = pnand %p444_p13, %p438_p10 }
  0x40   :  { %332 = vmatmul.mubr.msk.bf16.vlgmr.msra.gmra.mrb[0].mxu0 %vm86_vm1, %v62_v4 }
  0x41   :  { %344 = vmatpush3.bf16.msra.mxu0 %v367_v1  ;;  %347 = vmatprep.mubr.msk.bf16.mxu0 %vm471_vm0, %v470_v0 }
  0x42   :  { %345 = vmatprep.subr.bf16.mxu0 %v470_v0 }
  0x45   :  { %346 = vmatpush3.bf16.msra.mxu0 %v368_v2 }
 0x113   :  { %v124_v6 = vpop.f32.mrb[0].mxu0 }
 0x114   :  { %v125_v7 = vadd.f32 %v305_v5, %v124_v6  ;;  %v333_v8 = vpop.f32.mrb[1].mxu0 }
 0x115   :  { %v127_v9 = vpop.f32.mrb[2].mxu0 }
 0x116   :  { %v130_v10 = vmax.f32 %v125_v7, 0.0  ;;  %v334_v11 = vpop.f32.mrb[3].mxu0 }
 0x118   :  { %v131_v12 = vpack.c.bf16 %v130_v10, %v130_v10 }
 0x11a   :  { %340 = vmatmul.mubr.msk.bf16.vlgmr.msra.gmra.mrb[0].mxu1 %vm86_vm1, %v131_v12 }
 0x11b   :  { %355 = vmatprep.mubr.msk.bf16.mxu1 %vm471_vm0, %v470_v0  ;;  %352 = vmatpush3.bf16.msra.mxu1 %v369_v13 }
 0x11c   :  { %353 = vmatprep.subr.bf16.mxu1 %v470_v0 }
 0x11f   :  { %354 = vmatpush3.bf16.msra.mxu1 %v370_v21 }
 0x1ed   :  { %v169_v14 = vpop.f32.mrb[0].mxu1 }
 0x1ee   :  { %v170_v15 = vadd.f32 %v305_v5, %v169_v14  ;;  %v341_v16 = vpop.f32.mrb[1].mxu1 }
 0x1ef   :  { %v172_v17 = vpop.f32.mrb[2].mxu1 }
 0x1f0   :  { %v175_v18 = vmax.f32 %v170_v15, 0.0  ;;  %v342_v19 = vpop.f32.mrb[3].mxu1 }
 0x1f2   :  { %v176_v20 = vpack.c.bf16 %v175_v18, %v175_v18 }
 0x1f4   :  { %348 = vmatmul.mubr.msk.bf16.vlgmr.msra.gmra.mrb[4].mxu0 %vm86_vm1, %v176_v20 }
 0x2c7   :  { %v214_v22 = vpop.f32.mrb[4].mxu0 }
 0x2c8   :  { %v215_v23 = vadd.f32 %v305_v5, %v214_v22  ;;  %v349_v24 = vpop.f32.mrb[5].mxu0 }
 0x2c9   :  { %v217_v25 = vpop.f32.mrb[6].mxu0 }
 0x2ca   :  { %v220_v26 = vmax.f32 %v215_v23, 0.0  ;;  %v350_v27 = vpop.f32.mrb[7].mxu0 }
 0x2cc   :  { %v221_v28 = vpack.c.bf16 %v220_v26, %v220_v26 }
 0x2ce   :  { %356 = vmatmul.mubr.msk.bf16.vlgmr.msra.gmra.mrb[4].mxu1 %vm86_vm1, %v221_v28 }
 0x3a1   :  { %v282_v30 = vpop.f32.mrb[4].mxu1 }
 0x3a2   :  { %v283_v31 = vadd.f32 %v311_v29, %v282_v30  ;;  %v357_v32 = vpop.f32.mrb[5].mxu1 }
 0x3a3   :  { %v285_v33 = vpop.f32.mrb[6].mxu1 }
 0x3a4   :  { %288 = vst [vmem:[#allocation8] sm:$0xff] %v283_v31  ;;  %v358_v34 = vpop.f32.mrb[7].mxu1 }
 0x3a5   :  { %448 = shalt.err (!%p445_p0)
}
 0x3a6   :  { %s449_s4 = scalar_lea.hbm %s576_s5, 128 }
 0x3a7   :  { %p450_p1 = scmp.ne.s32.totalorder %s576_s5, %s449_s4  ;;  %p453_p2 = scmp.lt.u32.totalorder %s449_s4, %s576_s5 }
 0x3a9   :  { %p455_p3 = pnand %p453_p2, %p450_p1 }
 0x3ab   :  { %458 = shalt.err (!%p455_p3)
}
 0x3ac   :  { %298 = dma.vmem_to_hbm [thread:$0]  %s296_s7, 128, %s576_s5, [#allocation4]  }
 0x3ad   :  { %463 = dma.done.wait [#allocation4], 128  }
 0x3ae   :  { %464 = vsyncadd [#allocation4], 4294967168 }
 0x3af   :  { %302 = vsyncpa [#allocation3], 1 }
 0x3b0   :  { %303 = vsyncpa [#allocation6], 1 }
 0x3b1   :  { %304 = vsyncpa [#allocation4], 1 }

</bundles_post_ra>
